<compile_context>
chip_gen: v6e
topology: v6e:2x2x1
jax: 0.10.0
libtpu: 0.0.40
codegen_flags: <defaults>
</compile_context>

<pallas_src>
import functools

import jax
import jax.numpy as jnp
from jax import lax
from jax.experimental import pallas as pl
from jax.experimental.pallas import tpu as pltpu

# Lanes per column tile. f32: 3 * 131072 * 4 B = 1.5 MiB per block
# (3 MiB double-buffered) -> safe on v5e/v6e/v7x scoped-VMEM defaults while
# still being large enough to amortize per-grid-step overhead.
_MAX_TILE = 128 * 1024


def _choose_tile(hw: int) -> int:
    if hw <= 128:
        return hw                      # full-extent last dim (always legal)
    return (min(hw, _MAX_TILE) // 128) * 128   # 128-lane aligned


def _color_loss_kernel(x_ref, o_ref, acc_ref, *, hw, tile, needs_mask):
    # x_ref: (1, 3, TILE) input tile, native dtype
    # o_ref: (1, 1, 1) per-batch output
    # acc_ref: (3, 1) f32 running per-channel sum
    j = pl.program_id(1)

    @pl.when(j == 0)
    def _init():
        acc_ref[...] = jnp.zeros_like(acc_ref)

    x = x_ref[0]                                            # (3, TILE)
    if needs_mask:
        # Only emitted when H*W is not a multiple of the tile width:
        # zero out the padded columns of the final tile.
        cols = j * tile + lax.broadcasted_iota(jnp.int32, x.shape, 1)
        x = jnp.where(cols < hw, x, jnp.zeros((), dtype=x.dtype))

    # Accumulate in f32 without materializing a full f32 copy of the tile.
    acc_ref[...] += jnp.sum(x, axis=-1, keepdims=True, dtype=jnp.float32)

    @pl.when(j == pl.num_programs(1) - 1)
    def _epilogue():
        m = acc_ref[...] * jnp.float32(1.0 / hw)            # (3, 1) channel means
        mr = m[0:1, :]
        mg = m[1:2, :]
        mb = m[2:3, :]
        drg = (mr - mg) ** 2
        drb = (mr - mb) ** 2
        dgb = (mb - mg) ** 2
        k = jnp.sqrt(drg * drg + drb * drb + dgb * dgb)     # (1, 1)
        o_ref[0] = k.astype(o_ref.dtype)


def color_loss(x):
    b, c, h, w = x.shape
    assert c == 3, "ColorLoss expects 3 channels (RGB)"
    hw = h * w
    tile = _choose_tile(hw)
    num_j = pl.cdiv(hw, tile)
    needs_mask = (hw % tile) != 0

    xr = x.reshape(b, c, hw)           # free dim-merge on contiguous NCHW

    kernel = functools.partial(
        _color_loss_kernel, hw=hw, tile=tile, needs_mask=needs_mask
    )

    cost = pl.CostEstimate(
        flops=b * c * hw + 16 * b,                       # streaming adds + tiny epilogue
        transcendentals=b,                               # one sqrt per batch element
        bytes_accessed=x.size * x.dtype.itemsize + b * x.dtype.itemsize,
    )

    out = pl.pallas_call(
        kernel,
        out_shape=jax.ShapeDtypeStruct((b, 1, 1), x.dtype),
        grid_spec=pltpu.PrefetchScalarGridSpec(
            num_scalar_prefetch=0,
            grid=(b, num_j),
            in_specs=[pl.BlockSpec((1, c, tile), lambda i, j: (i, 0, j))],
            out_specs=pl.BlockSpec((1, 1, 1), lambda i, j: (i, 0, 0)),
            scratch_shapes=[pltpu.VMEM((c, 1), jnp.float32)],
        ),
        compiler_params=pltpu.CompilerParams(
            dimension_semantics=("parallel", "arbitrary"),
        ),
        cost_estimate=cost,
    )(xr)

    # Match torch output shape (B, 1, 1, 1).
    return out.reshape(b, 1, 1, 1)


def _color_loss_ref(x):
    mean_rgb = jnp.mean(x.astype(jnp.float32), axis=(2, 3), keepdims=True)
    mr = mean_rgb[:, 0:1]
    mg = mean_rgb[:, 1:2]
    mb = mean_rgb[:, 2:3]
    drg = (mr - mg) ** 2
    drb = (mr - mb) ** 2
    dgb = (mb - mg) ** 2
    return jnp.sqrt(drg ** 2 + drb ** 2 + dgb ** 2).astype(x.dtype)


if __name__ == "__main__":
    key = jax.random.PRNGKey(0)

    # Case 1: aligned H*W (256 -> single 256-lane tile per batch element).
    x1 = jax.random.uniform(key, (2, 3, 16, 16), dtype=jnp.float32)
    k1 = jax.block_until_ready(color_loss(x1))
    k1_ref = jax.block_until_ready(_color_loss_ref(x1))
    assert k1.shape == (2, 1, 1, 1), k1.shape
    assert jnp.allclose(k1, k1_ref, atol=1e-6, rtol=1e-5), (k1, k1_ref)

    # Case 2: ragged H*W (500 -> two 384-lane tiles, masked tail).
    x2 = jax.random.uniform(jax.random.PRNGKey(0), (2, 3, 20, 25), dtype=jnp.float32)
    k2 = jax.block_until_ready(color_loss(x2))
    k2_ref = jax.block_until_ready(_color_loss_ref(x2))
    assert k2.shape == (2, 1, 1, 1), k2.shape
    assert jnp.allclose(k2, k2_ref, atol=1e-6, rtol=1e-5), (k2, k2_ref)

    print("KERNEL_OK")
</pallas_src>

<mosaic_0001>
module attributes {stable_mosaic.version = 11 : i64} {
  func.func @_color_loss_kernel(%arg0: i32, %arg1: i32, %arg2: memref<1x3x256xf32, #tpu.memory_space<vmem>>, %arg3: memref<1x1x1xf32, #tpu.memory_space<vmem>>, %arg4: memref<3x1xf32, #tpu.memory_space<vmem>>) attributes {dimension_semantics = [#tpu.dimension_semantics<parallel>, #tpu.dimension_semantics<arbitrary>], iteration_bounds = array<i64: 2, 1>, scalar_prefetch = 0 : i64, scratch_operands = 1 : i64, tpu.core_type = #tpu.core_type<tc>, window_params = [{transform_indices = @transform_0, window_bounds = array<i64: 1, 3, 256>}, {transform_indices = @transform_1, window_bounds = array<i64: 1, 1, 1>}]} {
    %c0_i32 = arith.constant 0 : i32
    %0 = arith.cmpi eq, %arg1, %c0_i32 : i32
    %1 = arith.extui %0 : i1 to i32
    %c0_i32_0 = arith.constant 0 : i32
    %2 = arith.cmpi ne, %1, %c0_i32_0 : i32
    scf.if %2 {
      %cst_9 = arith.constant 0.000000e+00 : f32
      %13 = vector.broadcast %cst_9 : f32 to vector<3x1xf32>
      %c0_10 = arith.constant 0 : index
      %c0_11 = arith.constant 0 : index
      %14 = vector.load %arg4[%c0_10, %c0_11] : memref<3x1xf32, #tpu.memory_space<vmem>>, vector<3x1xf32>
      tpu.vector_store %arg4[%c0_10, %c0_11], %13 {strides = array<i32>} : memref<3x1xf32, #tpu.memory_space<vmem>>, vector<3x1xf32>,
    } else {
    }
    %c0 = arith.constant 0 : index
    %c0_1 = arith.constant 0 : index
    %c0_2 = arith.constant 0 : index
    %3 = vector.load %arg2[%c0, %c0_1, %c0_2] : memref<1x3x256xf32, #tpu.memory_space<vmem>>, vector<1x3x256xf32>
    %4 = vector.shape_cast %3 : vector<1x3x256xf32> to vector<3x256xf32>
    %c0_3 = arith.constant 0 : index
    %c0_4 = arith.constant 0 : index
    %5 = vector.load %arg4[%c0_3, %c0_4] : memref<3x1xf32, #tpu.memory_space<vmem>>, vector<3x1xf32>
    %cst = arith.constant dense<0.000000e+00> : vector<3xf32>
    %6 = vector.multi_reduction <add>, %4, %cst [1] : vector<3x256xf32> to vector<3xf32>
    %7 = vector.shape_cast %6 : vector<3xf32> to vector<3x1xf32>
    %8 = arith.addf %5, %7 : vector<3x1xf32>
    %c0_5 = arith.constant 0 : index
    %c0_6 = arith.constant 0 : index
    %9 = vector.load %arg4[%c0_5, %c0_6] : memref<3x1xf32, #tpu.memory_space<vmem>>, vector<3x1xf32>
    tpu.vector_store %arg4[%c0_5, %c0_6], %8 {strides = array<i32>} : memref<3x1xf32, #tpu.memory_space<vmem>>, vector<3x1xf32>,
    %c0_i32_7 = arith.constant 0 : i32
    %10 = arith.cmpi eq, %arg1, %c0_i32_7 : i32
    %11 = arith.extui %10 : i1 to i32
    %c0_i32_8 = arith.constant 0 : i32
    %12 = arith.cmpi ne, %11, %c0_i32_8 : i32
    scf.if %12 {
      %c0_9 = arith.constant 0 : index
      %c0_10 = arith.constant 0 : index
      %13 = vector.load %arg4[%c0_9, %c0_10] : memref<3x1xf32, #tpu.memory_space<vmem>>, vector<3x1xf32>
      %cst_11 = arith.constant 3.906250e-03 : f32
      %14 = vector.broadcast %cst_11 : f32 to vector<3x1xf32>
      %15 = arith.mulf %13, %14 : vector<3x1xf32>
      %16 = vector.extract_strided_slice %15 {offsets = [0, 0], sizes = [1, 1], strides = [1, 1]} : vector<3x1xf32> to vector<1x1xf32>
      %17 = vector.extract_strided_slice %15 {offsets = [1, 0], sizes = [1, 1], strides = [1, 1]} : vector<3x1xf32> to vector<1x1xf32>
      %18 = vector.extract_strided_slice %15 {offsets = [2, 0], sizes = [1, 1], strides = [1, 1]} : vector<3x1xf32> to vector<1x1xf32>
      %19 = arith.subf %16, %17 : vector<1x1xf32>
      %20 = arith.mulf %19, %19 : vector<1x1xf32>
      %21 = arith.subf %16, %18 : vector<1x1xf32>
      %22 = arith.mulf %21, %21 : vector<1x1xf32>
      %23 = arith.subf %18, %17 : vector<1x1xf32>
      %24 = arith.mulf %23, %23 : vector<1x1xf32>
      %25 = arith.mulf %20, %20 : vector<1x1xf32>
      %26 = arith.mulf %22, %22 : vector<1x1xf32>
      %27 = arith.addf %25, %26 : vector<1x1xf32>
      %28 = arith.mulf %24, %24 : vector<1x1xf32>
      %29 = arith.addf %27, %28 : vector<1x1xf32>
      %30 = math.sqrt %29 : vector<1x1xf32>
      %c0_12 = arith.constant 0 : index
      %c0_13 = arith.constant 0 : index
      %c0_14 = arith.constant 0 : index
      %31 = vector.load %arg3[%c0_12, %c0_13, %c0_14] : memref<1x1x1xf32, #tpu.memory_space<vmem>>, vector<1x1x1xf32>
      %32 = vector.shape_cast %31 : vector<1x1x1xf32> to vector<1x1xf32>
      %33 = vector.shape_cast %30 : vector<1x1xf32> to vector<1x1x1xf32>
      tpu.vector_store %arg3[%c0_12, %c0_13, %c0_14], %33 {strides = array<i32>} : memref<1x1x1xf32, #tpu.memory_space<vmem>>, vector<1x1x1xf32>,
    } else {
    }
    return
  }
  func.func @transform_0(%arg0: i32, %arg1: i32) -> (i32, i32, i32) {
    %c0_i32 = arith.constant 0 : i32
    %c0_i32_0 = arith.constant 0 : i32
    return %arg0, %c0_i32, %arg1 : i32, i32, i32
  }
  func.func @transform_1(%arg0: i32, %arg1: i32) -> (i32, i32, i32) {
    %c0_i32 = arith.constant 0 : i32
    %c0_i32_0 = arith.constant 0 : i32
    %c0_i32_1 = arith.constant 0 : i32
    return %arg0, %c0_i32, %c0_i32_0 : i32, i32, i32
  }
}

</mosaic_0001>

<bundles_post_ra>
// kernel: tpu_custom_call.1
= control target key start
LH: loop header
LB: loop body
LE: loop exit
PB: predicated region body
PF: predicated region fallthrough
CT: control target
= control target key end

     0   :  { %s330_s6 = smov 0   ;;  %s332_s7 = smov 0   ;;  %s369_s0 = inlined_call_operand.vmem [shape: f32[2,3,256], index: 0, kind: input, shape index: {}]   ;;  %s370_s1 = inlined_call_operand.vmem [shape: f32[2,1,1], index: 1, kind: output, shape index: {}]  }
   0x1   :  { %s334_s8 = smov 0  }
   0x2 LB: > { %s23_s9 = sadd.s32 1, %s313_s7  ;;  %p261_p0 = scmp.ge.s32.totalorder %s317_s8, 1  ;;  %s317_s8 = sphi %s334_s8, %s11_s8   ;;  %s313_s7 = sphi %s332_s7, %s372_s7   ;;  %s309_s6 = sphi %s330_s6, %s371_s6  }
   0x3   : > { %p25_p1 = scmp.ge.s32.totalorder %s23_s9, 2  ;;  %p106_p2 = scmp.lt.s32.totalorder %s317_s8, 3 }
   0x5   : > { %s374_s9 = smov (%p25_p1, %s23_s9), 0  ;;  %p107_p3 = pnand %p261_p0, %p106_p2 }
   0x6   : > { %p129_p4 = scmp.lt.s32.totalorder (!%p107_p3), %s309_s6, 1 }
   0x7   : > { %110 = sbr.rel (%p107_p3) target bundleno = 202 (0xca), region = 24 }
   0xc   : > { %vm145_vm0 = vcmask 2048   ;;  %v319_v0 = vmov 0.0   ;;  %s376_s6 = smov (!%p129_p4, %s309_s6), 1  ;;  %vm152_vm1 = vcmask 1042432   ;;  %vm194_vm3 = vcmask 0  }
   0xd   : > { %146 = vst.msk [vmem:[#allocation2] sm:$0x7] %vm145_vm0, %v319_v0  ;;  %s266_s10 = sshll.u32 %s376_s6, 3  ;;  %s140_s16 = scalar_lea.vmem %s370_s1, %s376_s6 }
   0xe   : > { %s136_s13 = scalar_lea.vmem %s369_s0, %s266_s10 }
   0xf   : > { %v147_v1 = vld [vmem:[%s136_s13] sm:$0x77] }
  0x10   : > { %v150_v2 = vcombine.high %v147_v1, %v147_v1  ;;  %v153_v3 = vsel %vm152_vm1, %v147_v1, 0.0 }
  0x12   : > { %v154_v4 = vsel %vm152_vm1, %v150_v2, 0.0 }
  0x13   : > { %v155_v5 = vadd.f32 %v154_v4, %v153_v3 }
  0x14   : > { %v148_v6 = vld [vmem:[#allocation2] sm:$0x7] }
  0x15   : > { %156 = vadd.xlane.f32.xlu0 %v155_v5 }
  0x9e   : > { %v157_v7 = vpop.xlane.xlu0 %156 }
  0x9f   : > { %v158_v8 = vadd.f32 %v157_v7, %v148_v6 }
  0xa1   : > { %160 = vst.msk [vmem:[#allocation2] sm:$0x7] %vm145_vm0, %v158_v8 }
  0xa8   : > { %v164_v9 = vld [vmem:[#allocation2] sm:$0x7] }
  0xa9   : > { %v165_v10 = vmul.f32 0.00390625, %v164_v9 }
  0xab   : > { %v167_v11 = vrot.slane %v165_v10, 1  ;;  %v171_v12 = vrot.slane %v165_v10, 2  ;;  %v175_v13 = vrot.slane %v165_v10, 7 }
  0xad   : > { %v169_v14 = vsub.f32 %v165_v10, %v167_v11  ;;  %v173_v15 = vsub.f32 %v165_v10, %v171_v12  ;;  %v177_v16 = vsub.f32 %v165_v10, %v175_v13 }
  0xaf   : > { %v170_v17 = vmul.f32 %v169_v14, %v169_v14  ;;  %v174_v18 = vmul.f32 %v173_v15, %v173_v15  ;;  %v178_v19 = vmul.f32 %v177_v16, %v177_v16 }
  0xb1   : > { %v179_v20 = vmul.f32 %v170_v17, %v170_v17  ;;  %v180_v21 = vmul.f32 %v174_v18, %v174_v18  ;;  %v182_v22 = vmul.f32 %v178_v19, %v178_v19 }
  0xb3   : > { %v181_v23 = vadd.f32 %v180_v21, %v179_v20  ;;  %v184_v24 = vrot.slane %v182_v22, 2 }
  0xb5   : > { %v186_v25 = vadd.f32 %v184_v24, %v181_v23 }
  0xb7   : > { %293 = vrsqrt.f32 %v186_v25  ;;  %vm189_vm2 = vcmp.eq.f32.partialorder %v186_v25, inf  ;;  %v192_v28 = vand.u32 2147483648, %v186_v25  ;;  %vm191_vm4 = vcmp.eq.f32.partialorder %v186_v25, 0.0 }
  0xc4   : > { %v294_v26 = vpop.eup %293 }
  0xc5   : > { %v188_v27 = vmul.f32 %v294_v26, %v186_v25 }
  0xc7   : > { %v190_v29 = vsel %vm189_vm2, %v186_v25, %v188_v27 }
  0xc8   : > { %v193_v30 = vsel %vm191_vm4, %v192_v28, %v190_v29 }
  0xc9   : > { %195 = vst.msk [vmem:[%s140_s16] sm:$0x1] %vm194_vm3, %v193_v30 }
  0xca PF: > { %s11_s8 = sadd.s32 1, %s317_s8   ;;  %s371_s6 = smov %s313_s7 }
  0xcb   : > { %p8_p5 = scmp.ge.s32.totalorder %s11_s8, 4   ;;  %s372_s7 = smov %s374_s9 }
  0xcd   :  { %10 = sbr.rel (!%p8_p5) target bundleno = 2 (0x2), region = 62 }

</bundles_post_ra>
